<compile_context>
chip_gen: v5e
topology: v5e:2x2
jax: 0.10.0
libtpu: 0.0.40
codegen_flags: <defaults>
</compile_context>

<pallas_src>
import jax
import jax.numpy as jnp
from jax.experimental import pallas as pl
from jax.experimental.pallas import tpu as pltpu

_MIB = 1024 * 1024


def _round_up(x, m):
    return ((x + m - 1) // m) * m


def _vmem_capacity_bytes():
    """Physical VMEM per TensorCore; conservative (v7x = 64 MiB) fallback."""
    try:
        return int(pltpu.get_tpu_info().vmem_capacity_bytes)
    except Exception:
        return 64 * _MIB


def _num_tensorcores():
    """TensorCores per chip (v7x has 2); safe fallback of 1."""
    try:
        kind = jax.devices()[0].device_kind.lower()
        if "v7" in kind or "7x" in kind:
            return 2
    except Exception:
        pass
    return 1


def _select_tk(n_in, itemsize, vmem_cap):
    """Pick the K tile (and padded K) — generation/dtype aware.

    Single-K-block tiling keeps the x tile's block index constant across the j sweep,
    so Pallas skips the x re-DMA entirely; the threshold is smaller on 64 MiB (v7x).
    Large non-divisible n_in is zero-padded to a capped tile instead of returning n_in.
    """
    if vmem_cap <= 64 * _MIB:
        single_k_max = 3072
    else:
        single_k_max = 8192 if itemsize <= 2 else 4096
    if n_in <= single_k_max:
        return n_in, n_in
    cands = (2048, 1024, 512, 256) if itemsize <= 2 else (1024, 512, 256, 128)
    for c in cands:
        if n_in % c == 0:
            return c, n_in
    tk = 512
    return tk, _round_up(n_in, tk)


def mlp_kernel(x_ref, w_ref, b_ref, o_ref, acc_ref):
    # x_ref:   (tm, tk)  input-row tile (matmul dtype)
    # w_ref:   (tk, tn)  pre-transposed weight tile (n_in, n_out layout)
    # b_ref:   (1, tn)   bias row tile (f32)
    # o_ref:   (tm, tn)  output tile (written once, at the last K step)
    # acc_ref: (tm, tn)  f32 accumulator scratch
    k = pl.program_id(2)

    @pl.when(k == 0)
    def _():
        # Bias folded into the accumulator init -> epilogue is pure LeakyReLU.
        acc_ref[...] = jnp.broadcast_to(b_ref[...].astype(jnp.float32), acc_ref.shape)

    # Plain (tm,tk)@(tk,tn): contraction is along the sublane dim of W, so Mosaic
    # issues vmatmul without a per-step vxpose competing for the extended slots.
    acc_ref[...] += jnp.dot(x_ref[...], w_ref[...], preferred_element_type=jnp.float32)

    @pl.when(k == pl.num_programs(2) - 1)
    def _():
        y = acc_ref[...]
        # LeakyReLU(negative_slope=0.1) as a single vmul + vmax.
        o_ref[...] = jnp.maximum(y, 0.1 * y).astype(o_ref.dtype)
        # TODO(synk): SharedDropout (training-mode row-shared dropout) not applied;
        # p=0 default / eval mode is identity.


def prepare_mlp_params(weight, bias, *, matmul_dtype=jnp.bfloat16):
    """One-time weight preprocessing (hoist out of the hot path).

    weight: [n_out, n_in] (PyTorch Linear layout), bias: [n_out].
    Returns (w_t, b_row, n_out) with w_t: [n_in_pad, n_out_pad] in matmul_dtype,
    b_row: [1, n_out_pad] f32.  n_out is padded to a lane multiple (128) so output
    stores are lane-dense; n_in is padded only when no clean K tile divides it.
    """
    n_out, n_in = weight.shape
    itemsize = jnp.dtype(matmul_dtype).itemsize
    _, n_in_pad = _select_tk(n_in, itemsize, _vmem_capacity_bytes())
    n_out_pad = _round_up(n_out, 128)
    w_t = jnp.asarray(weight).T.astype(matmul_dtype)  # (n_in, n_out)
    w_t = jnp.pad(w_t, ((0, n_in_pad - n_in), (0, n_out_pad - n_out)))
    b_row = jnp.pad(jnp.asarray(bias, jnp.float32), (0, n_out_pad - n_out))
    b_row = b_row.reshape(1, n_out_pad)
    return w_t, b_row, n_out


def mlp_forward_prepared(x, w_t, b_row, n_out, *, tm=None, tn=None, tk=None):
    """x: [..., n_in]; w_t/b_row from prepare_mlp_params."""
    n_in_pad, n_out_pad = w_t.shape
    lead = x.shape[:-1]
    n_in = x.shape[-1]
    m = 1
    for d in lead:
        m *= d

    out_dtype = x.dtype
    in_dtype = w_t.dtype
    in_itemsize = jnp.dtype(in_dtype).itemsize
    out_itemsize = jnp.dtype(out_dtype).itemsize

    vmem_cap = _vmem_capacity_bytes()
    # Leave headroom for Mosaic internal scratch/semaphores; never ask for all of VMEM.
    vmem_ceiling = max(32 * _MIB, min(vmem_cap - 16 * _MIB, 100 * _MIB))

    x2d = x.reshape(m, n_in).astype(in_dtype)
    if n_in_pad != n_in:
        x2d = jnp.pad(x2d, ((0, 0), (0, n_in_pad - n_in)))

    if tk is None:
        tk, _ = _select_tk(n_in_pad, in_itemsize, vmem_cap)
    assert n_in_pad % tk == 0, "tk must divide the (padded) n_in"

    # bf16 packs 2 rows per sublane -> tm multiple of 16; f32 -> multiple of 8.
    align_m = 16 if in_itemsize == 2 else 8
    max_tile = 1024 if vmem_ceiling > 64 * _MIB else 512
    if tm is None:
        tm = min(max_tile, _round_up(m, align_m))
    if tn is None:
        tn = next((c for c in (1024, 512, 256, 128)
                   if c <= max_tile and n_out_pad % c == 0), 128)

    # v7x has 2 TensorCores: ensure at least one parallel grid axis has >= 2 blocks.
    if _num_tensorcores() >= 2 and pl.cdiv(m, tm) * (n_out_pad // tn) < 2:
        split_tn = next((c for c in (512, 256, 128)
                         if c < tn and n_out_pad % c == 0 and n_out_pad // c >= 2), None)
        if split_tn is not None:
            tn = split_tn
        elif m > align_m:
            tm = _round_up(pl.cdiv(m, 2), align_m)

    def _est(tm_, tn_):
        # Double-buffered x/w/out/bias tiles + f32 accumulator scratch.
        return ((2 * tm_ * tk + 2 * tk * tn_) * in_itemsize
                + 2 * tm_ * tn_ * out_itemsize + 2 * tn_ * 4 + tm_ * tn_ * 4)

    # Shrink tiles until the working set fits the VMEM budget.
    while _est(tm, tn) > vmem_ceiling and (tm > align_m or tn > 128):
        if tm >= tn and tm > align_m:
            tm = max(align_m, _round_up(tm // 2, align_m))
        elif tn > 128:
            tn = max(128, tn // 2)
        else:
            tm = max(align_m, _round_up(tm // 2, align_m))

    grid = (pl.cdiv(m, tm), n_out_pad // tn, n_in_pad // tk)
    vmem_limit = int(min(vmem_ceiling, max(32 * _MIB, 2 * _est(tm, tn))))

    cost = pl.CostEstimate(
        flops=2 * m * n_out_pad * n_in_pad,
        transcendentals=0,
        bytes_accessed=(m * n_in_pad * in_itemsize
                        + n_in_pad * n_out_pad * in_itemsize
                        + m * n_out_pad * out_itemsize
                        + n_out_pad * 4),
    )

    out2d = pl.pallas_call(
        mlp_kernel,
        out_shape=jax.ShapeDtypeStruct((m, n_out_pad), out_dtype),
        grid_spec=pltpu.PrefetchScalarGridSpec(
            num_scalar_prefetch=0,
            grid=grid,
            in_specs=[
                pl.BlockSpec((tm, tk), lambda i, j, k: (i, k)),   # x
                pl.BlockSpec((tk, tn), lambda i, j, k: (k, j)),   # W^T (pre-transposed)
                pl.BlockSpec((1, tn), lambda i, j, k: (0, j)),    # bias row
            ],
            out_specs=pl.BlockSpec((tm, tn), lambda i, j, k: (i, j)),
            scratch_shapes=[pltpu.VMEM((tm, tn), jnp.float32)],
        ),
        compiler_params=pltpu.CompilerParams(
            dimension_semantics=("parallel", "parallel", "arbitrary"),
            vmem_limit_bytes=vmem_limit,
        ),
        cost_estimate=cost,
    )(x2d, w_t, b_row)

    if n_out_pad != n_out:
        # TODO(synk): for a fused consumer, keep the padded (m, n_out_pad) output to
        # avoid this extra O(m*n_out) HBM pass.
        out2d = out2d[:, :n_out]
    return out2d.reshape(*lead, n_out)


def mlp_forward(x, weight, bias, *, matmul_dtype=jnp.bfloat16, tm=None, tn=None, tk=None):
    """Convenience wrapper: prepares params every call.  For inference, call
    prepare_mlp_params() once and reuse (w_t, b_row) with mlp_forward_prepared()."""
    w_t, b_row, n_out = prepare_mlp_params(weight, bias, matmul_dtype=matmul_dtype)
    return mlp_forward_prepared(x, w_t, b_row, n_out, tm=tm, tn=tn, tk=tk)


if __name__ == "__main__":
    key = jax.random.PRNGKey(0)
    k_x, k_w = jax.random.split(key)

    batch, seq, n_in, n_out = 2, 8, 32, 64

    # Deterministic parameter init mirroring MLP.reset_parameters():
    #   orthogonal_ weight, zero bias.
    weight = jax.nn.initializers.orthogonal()(k_w, (n_out, n_in), jnp.float32)
    bias = jnp.zeros((n_out,), jnp.float32)

    x = jax.random.normal(k_x, (batch, seq, n_in), jnp.float32)

    # Pure-JAX reference.
    ref = x @ weight.T + bias
    ref = jnp.where(ref >= 0, ref, 0.1 * ref)

    # Exact f32 path: module semantics bit-for-bit (up to f32 matmul rounding).
    out_f32 = mlp_forward(x, weight, bias, matmul_dtype=jnp.float32)
    out_f32 = jax.block_until_ready(out_f32)
    assert out_f32.shape == (batch, seq, n_out)
    assert jnp.allclose(out_f32, ref, atol=1e-5, rtol=1e-5)

    # Default bf16-matmul perf path (f32 accumulation) -- looser tolerance.
    out = mlp_forward(x, weight, bias)
    out = jax.block_until_ready(out)
    assert out.shape == (batch, seq, n_out)
    assert jnp.allclose(out, ref, atol=5e-2, rtol=5e-2)

    # Hoisted-preprocessing path (one-time prepared weights).
    w_t, b_row, n_out_v = prepare_mlp_params(weight, bias)
    out_prep = mlp_forward_prepared(x, w_t, b_row, n_out_v)
    out_prep = jax.block_until_ready(out_prep)
    assert out_prep.shape == (batch, seq, n_out)
    assert jnp.allclose(out_prep, ref, atol=5e-2, rtol=5e-2)

    print("KERNEL_OK")
</pallas_src>

<mosaic_0001>
module attributes {stable_mosaic.version = 11 : i64} {
  func.func @mlp_kernel(%arg0: i32, %arg1: i32, %arg2: i32, %arg3: memref<16x32xf32, #tpu.memory_space<vmem>>, %arg4: memref<32x128xf32, #tpu.memory_space<vmem>>, %arg5: memref<1x128xf32, #tpu.memory_space<vmem>>, %arg6: memref<16x128xf32, #tpu.memory_space<vmem>>, %arg7: memref<16x128xf32, #tpu.memory_space<vmem>>) attributes {dimension_semantics = [#tpu.dimension_semantics<parallel>, #tpu.dimension_semantics<parallel>, #tpu.dimension_semantics<arbitrary>], iteration_bounds = array<i64: 1, 1, 1>, scalar_prefetch = 0 : i64, scratch_operands = 1 : i64, tpu.core_type = #tpu.core_type<tc>, window_params = [{transform_indices = @transform_0, window_bounds = array<i64: 16, 32>}, {transform_indices = @transform_1, window_bounds = array<i64: 32, 128>}, {transform_indices = @transform_2, window_bounds = array<i64: 1, 128>}, {transform_indices = @transform_3, window_bounds = array<i64: 16, 128>}]} {
    %c0_i32 = arith.constant 0 : i32
    %0 = arith.cmpi eq, %arg2, %c0_i32 : i32
    %1 = arith.extui %0 : i1 to i32
    %c0_i32_0 = arith.constant 0 : i32
    %2 = arith.cmpi ne, %1, %c0_i32_0 : i32
    scf.if %2 {
      %c0_10 = arith.constant 0 : index
      %c0_11 = arith.constant 0 : index
      %12 = vector.load %arg5[%c0_10, %c0_11] : memref<1x128xf32, #tpu.memory_space<vmem>>, vector<1x128xf32>
      %13 = vector.shape_cast %12 : vector<1x128xf32> to vector<1x128xf32>
      %14 = vector.broadcast %13 : vector<1x128xf32> to vector<16x128xf32>
      %c0_12 = arith.constant 0 : index
      %c0_13 = arith.constant 0 : index
      %15 = vector.load %arg7[%c0_12, %c0_13] : memref<16x128xf32, #tpu.memory_space<vmem>>, vector<16x128xf32>
      tpu.vector_store %arg7[%c0_12, %c0_13], %14 {strides = array<i32>} : memref<16x128xf32, #tpu.memory_space<vmem>>, vector<16x128xf32>,
    } else {
    }
    %c0 = arith.constant 0 : index
    %c0_1 = arith.constant 0 : index
    %3 = vector.load %arg7[%c0, %c0_1] : memref<16x128xf32, #tpu.memory_space<vmem>>, vector<16x128xf32>
    %c0_2 = arith.constant 0 : index
    %c0_3 = arith.constant 0 : index
    %4 = vector.load %arg3[%c0_2, %c0_3] : memref<16x32xf32, #tpu.memory_space<vmem>>, vector<16x32xf32>
    %c0_4 = arith.constant 0 : index
    %c0_5 = arith.constant 0 : index
    %5 = vector.load %arg4[%c0_4, %c0_5] : memref<32x128xf32, #tpu.memory_space<vmem>>, vector<32x128xf32>
    %cst = arith.constant dense<0.000000e+00> : vector<16x128xf32>
    %6 = tpu.matmul %4, %5, %cst {dimension_numbers = #tpu.dot_dimension_numbers<[1], [0], [0], [1], [0, 0, 1, 1], [], []>} : vector<16x32xf32>, vector<32x128xf32>, vector<16x128xf32> -> vector<16x128xf32>
    %7 = arith.addf %3, %6 : vector<16x128xf32>
    %c0_6 = arith.constant 0 : index
    %c0_7 = arith.constant 0 : index
    %8 = vector.load %arg7[%c0_6, %c0_7] : memref<16x128xf32, #tpu.memory_space<vmem>>, vector<16x128xf32>
    tpu.vector_store %arg7[%c0_6, %c0_7], %7 {strides = array<i32>} : memref<16x128xf32, #tpu.memory_space<vmem>>, vector<16x128xf32>,
    %c0_i32_8 = arith.constant 0 : i32
    %9 = arith.cmpi eq, %arg2, %c0_i32_8 : i32
    %10 = arith.extui %9 : i1 to i32
    %c0_i32_9 = arith.constant 0 : i32
    %11 = arith.cmpi ne, %10, %c0_i32_9 : i32
    scf.if %11 {
      %c0_10 = arith.constant 0 : index
      %c0_11 = arith.constant 0 : index
      %12 = vector.load %arg7[%c0_10, %c0_11] : memref<16x128xf32, #tpu.memory_space<vmem>>, vector<16x128xf32>
      %cst_12 = arith.constant 1.000000e-01 : f32
      %13 = vector.broadcast %cst_12 : f32 to vector<16x128xf32>
      %14 = arith.mulf %13, %12 : vector<16x128xf32>
      %15 = arith.maximumf %12, %14 : vector<16x128xf32>
      %c0_13 = arith.constant 0 : index
      %c0_14 = arith.constant 0 : index
      %16 = vector.load %arg6[%c0_13, %c0_14] : memref<16x128xf32, #tpu.memory_space<vmem>>, vector<16x128xf32>
      tpu.vector_store %arg6[%c0_13, %c0_14], %15 {strides = array<i32>} : memref<16x128xf32, #tpu.memory_space<vmem>>, vector<16x128xf32>,
    } else {
    }
    return
  }
  func.func @transform_0(%arg0: i32, %arg1: i32, %arg2: i32) -> (i32, i32) {
    %c0_i32 = arith.constant 0 : i32
    return %arg0, %arg2 : i32, i32
  }
  func.func @transform_1(%arg0: i32, %arg1: i32, %arg2: i32) -> (i32, i32) {
    %c0_i32 = arith.constant 0 : i32
    return %arg2, %arg1 : i32, i32
  }
  func.func @transform_2(%arg0: i32, %arg1: i32, %arg2: i32) -> (i32, i32) {
    %c0_i32 = arith.constant 0 : i32
    %c0_i32_0 = arith.constant 0 : i32
    return %c0_i32, %arg1 : i32, i32
  }
  func.func @transform_3(%arg0: i32, %arg1: i32, %arg2: i32) -> (i32, i32) {
    %c0_i32 = arith.constant 0 : i32
    return %arg0, %arg1 : i32, i32
  }
}

</mosaic_0001>

<bundles_post_ra>
// kernel: tpu_custom_call.1
= control target key start
LH: loop header
LB: loop body
LE: loop exit
PB: predicated region body
PF: predicated region fallthrough
CT: control target
= control target key end

     0   :  { %8 = vsyncpa [#allocation4], 0  ;;  %s266_s0 = inlined_call_operand.hbm [shape: f32[16,32], index: 0, kind: input, shape index: {}]   ;;  %s267_s1 = inlined_call_operand.hbm [shape: f32[32,128], index: 1, kind: input, shape index: {}]   ;;  %s268_s2 = inlined_call_operand.vmem [shape: f32[1,128], index: 2, kind: input, shape index: {}]   ;;  %s269_s3 = inlined_call_operand.hbm [shape: f32[16,128], index: 3, kind: output, shape index: {}]  }
   0x1   :  { %9 = vsyncpa [#allocation7], 0 }
   0x2   :  { %10 = vsyncpa [#allocation5], 0  ;;  %s15_s14 = sshll.u32 %s266_s0, 4  ;;  %s220_s15 = smov [#allocation3]   ;;  %s16_s14 = int_to_ptr.hbm [resolvable:$true] %s15_s14 }
   0x3   :  { %s17_s16 = sshll.u32 %s220_s15, 4  ;;  %s28_s19 = sshll.u32 %s267_s1, 4  ;;  %s18_s16 = int_to_ptr.vmem [resolvable:$true] %s17_s16  ;;  %s29_s19 = int_to_ptr.hbm [resolvable:$true] %s28_s19 }
   0x4   :  { %s221_s20 = smov 128   ;;  %s222_s21 = smov 8  }
   0x5   :  { %23 = dma.hbm_to_vmem [thread:$0]  %s16_s14, 256, %s18_s16, [#allocation4], %s221_s20, %s221_s20, %s222_s21  }
   0x6   :  { %s223_s22 = smov [#allocation6]  }
   0x7   :  { %s30_s23 = sshll.u32 %s223_s22, 4  ;;  %s31_s23 = int_to_ptr.vmem [resolvable:$true] %s30_s23 }
   0x8   :  { %36 = dma.hbm_to_vmem [thread:$0]  %s29_s19, 512, %s31_s23, [#allocation7], %s221_s20, %s221_s20, %s222_s21  }
   0x9   :  { %214 = dma.done.wait [#allocation4], 256  }
   0xa   :  { %215 = vsyncadd [#allocation4], 4294967040 }
   0xb   :  { %216 = dma.done.wait [#allocation7], 512  }
   0xc   :  { %217 = vsyncadd [#allocation7], 4294966784  ;;  %v64_v0 = vld [vmem:[#allocation6 + $0x18] sm:$0xff]  ;;  %v63_v1 = vld [vmem:[#allocation6 + $0x10] sm:$0xff]  ;;  %vm65_vm0 = vcmask 261120   ;;  %s224_s24 = smov [#allocation8]  }
   0xd   :  { %84 = vmatpush.msra.mxu0 %v64_v0  ;;  %132 = vmatpush.msra.mxu1 %v64_v0  ;;  %v62_v2 = vld [vmem:[#allocation6 + $0x8] sm:$0xff]  ;;  %v61_v3 = vld [vmem:[#allocation6] sm:$0xff]  ;;  %v59_v4 = vld [vmem:[#allocation3] sm:$0xff]  ;;  %s114_s25 = sshll.u32 %s224_s24, 4  ;;  %s116_s28 = sshll.u32 %s269_s3, 4  ;;  %s115_s25 = int_to_ptr.vmem [resolvable:$true] %s114_s25  ;;  %s117_s28 = int_to_ptr.hbm [resolvable:$true] %s116_s28 }
   0xe   :  { %v60_v5 = vld [vmem:[#allocation3 + $0x8] sm:$0xff]  ;;  %v141_v6 = vld [vmem:[%s268_s2] ss:$0 sm:$0xff] }
   0xf   :  { %85 = vmatpush.msra.mxu0 %v63_v1  ;;  %133 = vmatpush.msra.mxu1 %v63_v1 }
  0x11   :  { %86 = vmatpush.msra.mxu0 %v62_v2  ;;  %134 = vmatpush.msra.mxu1 %v62_v2 }
  0x13   :  { %87 = vmatpush.msra.mxu0 %v61_v3  ;;  %135 = vmatpush.msra.mxu1 %v61_v3 }
  0x14   :  { %130 = vmatmul.msk.f32.vlgmr.msra.gmra.mxu0 %vm65_vm0, %v59_v4  ;;  %131 = vmatmul.msk.f32.vlgmr.msra.gmra.mxu1 %vm65_vm0, %v60_v5 }
  0x91   :  { %v89_v7 = vpop.f32.mrf.mxu0  ;;  %v92_v8 = vpop.f32.mrf.mxu1 }
  0x92   :  { %v95_v9 = vadd.f32 %v141_v6, %v89_v7  ;;  %v96_v10 = vadd.f32 %v141_v6, %v92_v8 }
  0x94   :  { %v104_v11 = vmul.f32 0.1, %v95_v9  ;;  %v105_v12 = vmul.f32 0.1, %v96_v10 }
  0x96   :  { %v106_v13 = vmax.f32 %v95_v9, %v104_v11  ;;  %v107_v14 = vmax.f32 %v96_v10, %v105_v12 }
  0x98   :  { %108 = vst [vmem:[#allocation8] sm:$0xff] %v106_v13 }
  0x99   :  { %109 = vst [vmem:[#allocation8 + $0x8] sm:$0xff] %v107_v14 }
  0x9a   :  { %122 = dma.vmem_to_hbm [thread:$0]  %s115_s25, 256, %s117_s28, [#allocation5], %s221_s20, %s221_s20, %s222_s21  }
  0x9b   :  { %218 = dma.done.wait [#allocation5], 256  }
  0x9c   :  { %219 = vsyncadd [#allocation5], 4294967040 }
  0x9d   :  { %127 = vsyncpa [#allocation4], 1 }
  0x9e   :  { %128 = vsyncpa [#allocation7], 1 }
  0x9f   :  { %129 = vsyncpa [#allocation5], 1 }

</bundles_post_ra>
